<compile_context>
chip_gen: v7x
topology: tpu7x:2x2x1
jax: 0.10.0
libtpu: 0.0.40
codegen_flags: <defaults>
</compile_context>

<pallas_src>
import math
from dataclasses import dataclass

import jax
import jax.numpy as jnp
from jax.experimental import pallas as pl
from jax.experimental.pallas import tpu as pltpu


@dataclass
class Config:
    d_head: int = 64
    d_mlp: int = 3072
    d_model: int = 768
    d_vocab: int = 50257
    debug: bool = True
    init_range: float = 0.02
    layer_norm_eps: float = 1e-05
    n_ctx: int = 1024
    n_heads: int = 12
    n_layers: int = 12


_MIB = 1024 * 1024
_MAX_TILE_BYTES = 16 * _MIB      # per-output-buffer cap (v5e/v6e class)
_MIN_TILE_BYTES = 2 * _MIB
_VMEM_SLACK_BYTES = 4 * _MIB


def _vmem_capacity_bytes() -> int:
    """Physical VMEM of the current chip; conservative fallback if unknown."""
    try:
        cap = getattr(pltpu.get_tpu_info(), "vmem_capacity_bytes", None)
        if cap:
            return int(cap)
    except Exception:
        pass
    return 64 * _MIB  # v7x per-TensorCore VMEM (smallest current generation)


def _pos_embed_kernel(w_pos_ref, out_ref):
    # w_pos_ref: (seq_len, d_model) VMEM tile — same constant block every step.
    # out_ref:   (batch_block * seq_len, d_model) lane/sublane-dense 2-D slab.
    seq_len = w_pos_ref.shape[0]
    reps = out_ref.shape[0] // seq_len
    w = w_pos_ref[...]
    aligned = (seq_len % 8) == 0

    if reps == 1:
        out_ref[...] = w
        return

    if reps <= 8:
        # Static unroll: static offsets, one W_pos slab of vregs stays live.
        for i in range(reps):
            out_ref[pl.ds(i * seq_len, seq_len), :] = w
    else:
        def body(i, carry):
            start = i * seq_len
            if aligned:
                start = pl.multiple_of(start, 8)
            out_ref[pl.ds(start, seq_len), :] = w
            return carry

        jax.lax.fori_loop(0, reps, body, 0)


def pos_embed(tokens: jax.Array, w_pos: jax.Array, *, batch_block: int | None = None) -> jax.Array:
    """tokens: int [batch, seq_len] (values unused); w_pos: [n_ctx, d_model].

    Returns [batch, seq_len, d_model] == w_pos[:seq_len] broadcast over batch.
    """
    batch, seq_len = tokens.shape
    n_ctx, d_model = w_pos.shape
    assert seq_len <= n_ctx, "seq_len exceeds n_ctx"

    # Pre-slice so the kernel input block equals the full (sliced) array dims:
    # no (8,128) divisibility constraint even for arbitrary seq_len.
    w_pos_slice = w_pos[:seq_len]

    itemsize = jnp.dtype(w_pos.dtype).itemsize
    row_bytes = seq_len * d_model * itemsize      # one batch row of the output
    wpos_bytes = row_bytes

    # Generation-aware VMEM budget: 2 output buffers + single-buffered W_pos
    # + slack must fit the scoped limit, kept <= half of physical VMEM.
    vmem_cap = _vmem_capacity_bytes()
    vmem_limit = max(16 * _MIB, min(vmem_cap // 2, 48 * _MIB))
    tile_bytes = (vmem_limit - wpos_bytes - _VMEM_SLACK_BYTES) // 2
    tile_bytes = max(_MIN_TILE_BYTES, min(tile_bytes, _MAX_TILE_BYTES))

    # Smallest repetition count whose flattened row count is a multiple of 8
    # (sublane alignment requirement on the output block).
    base = 8 // math.gcd(seq_len, 8)

    if batch_block is None:
        bb = max(1, tile_bytes // row_bytes)
    else:
        bb = max(1, int(batch_block))
    bb = max(base, (bb // base) * base)           # sublane-aligned block rows

    if bb >= batch:
        if batch_block is None and batch >= 2 * base:
            # Cap so the grid has >= 2 steps: v7x megacore can then shard the
            # batch axis across both TensorCores.
            half = (batch + 1) // 2
            bb = max(base, (half // base) * base)
        else:
            bb = batch                            # single full-array block
    bb = int(bb)

    grid_steps = -(-batch // bb)                  # ceil division
    flat_rows = batch * seq_len
    block_rows = bb * seq_len

    out_bytes = flat_rows * d_model * itemsize
    cost = pl.CostEstimate(
        flops=0, transcendentals=0, bytes_accessed=out_bytes + wpos_bytes
    )

    grid_spec = pltpu.PrefetchScalarGridSpec(
        num_scalar_prefetch=0,
        grid=(grid_steps,),
        in_specs=[
            # Same (seq_len, d_model) slab of W_pos at every grid step; the
            # constant block index means no re-fetch, and Buffered(1) drops
            # the unnecessary second input buffer.
            pl.BlockSpec(
                (seq_len, d_model),
                lambda b: (0, 0),
                pipeline_mode=pl.Buffered(1),
            ),
        ],
        out_specs=pl.BlockSpec((block_rows, d_model), lambda b: (b, 0)),
    )

    out2d = pl.pallas_call(
        _pos_embed_kernel,
        out_shape=jax.ShapeDtypeStruct((flat_rows, d_model), w_pos.dtype),
        grid_spec=grid_spec,
        compiler_params=pltpu.CompilerParams(
            dimension_semantics=("parallel",),
            vmem_limit_bytes=int(vmem_limit),
        ),
        cost_estimate=cost,
    )(w_pos_slice)

    # Free reshape (row-major contiguity preserved).
    return out2d.reshape(batch, seq_len, d_model)


if __name__ == "__main__":
    cfg = Config()
    key = jax.random.PRNGKey(0)
    k_w, k_tok = jax.random.split(key)

    # Deterministic parameter init mirroring nn.init.normal_(std=init_range).
    W_pos = cfg.init_range * jax.random.normal(
        k_w, (cfg.n_ctx, cfg.d_model), dtype=jnp.float32
    )

    def reference(tok):
        b, s = tok.shape
        return jnp.broadcast_to(W_pos[:s][None], (b, s, cfg.d_model))

    # --- Test 1: small aligned seq_len; grid splits into 2 parallel steps. ---
    tokens = jax.random.randint(
        k_tok, (2, 8), minval=0, maxval=cfg.d_vocab, dtype=jnp.int32
    )
    out = jax.block_until_ready(pos_embed(tokens, W_pos))
    assert out.shape == (2, 8, cfg.d_model)
    assert out.dtype == jnp.float32
    assert bool(jnp.allclose(out, reference(tokens)))

    # --- Test 2: non-multiple-of-8 seq_len, multi-step grid, even split. ---
    tokens2 = jnp.zeros((8, 12), dtype=jnp.int32)
    out2 = jax.block_until_ready(pos_embed(tokens2, W_pos))
    assert out2.shape == (8, 12, cfg.d_model)
    assert bool(jnp.allclose(out2, reference(tokens2)))

    # --- Test 3: ragged final grid step (batch % batch_block != 0). ---
    tokens3 = jnp.zeros((7, 12), dtype=jnp.int32)
    out3 = jax.block_until_ready(pos_embed(tokens3, W_pos, batch_block=4))
    assert out3.shape == (7, 12, cfg.d_model)
    assert bool(jnp.allclose(out3, reference(tokens3)))

    # --- Test 4: odd seq_len -> single full-array block path. ---
    tokens4 = jnp.zeros((2, 7), dtype=jnp.int32)
    out4 = jax.block_until_ready(pos_embed(tokens4, W_pos))
    assert out4.shape == (2, 7, cfg.d_model)
    assert bool(jnp.allclose(out4, reference(tokens4)))

    print("KERNEL_OK")
</pallas_src>

<mosaic_0001>
module attributes {stable_mosaic.version = 11 : i64} {
  func.func @_pos_embed_kernel(%arg0: i32, %arg1: memref<8x768xf32, #tpu.memory_space<vmem>>, %arg2: memref<8x768xf32, #tpu.memory_space<vmem>>) attributes {dimension_semantics = [#tpu.dimension_semantics<parallel>], iteration_bounds = array<i64: 2>, scalar_prefetch = 0 : i64, scratch_operands = 0 : i64, tpu.core_type = #tpu.core_type<tc>, window_params = [{pipeline_mode = #tpu.pipeline_mode<synchronous>, transform_indices = @transform_0, window_bounds = array<i64: 8, 768>}, {transform_indices = @transform_1, window_bounds = array<i64: 8, 768>}]} {
    %c0 = arith.constant 0 : index
    %c0_0 = arith.constant 0 : index
    %0 = vector.load %arg1[%c0, %c0_0] : memref<8x768xf32, #tpu.memory_space<vmem>>, vector<8x768xf32>
    %c0_1 = arith.constant 0 : index
    %c0_2 = arith.constant 0 : index
    %1 = vector.load %arg2[%c0_1, %c0_2] : memref<8x768xf32, #tpu.memory_space<vmem>>, vector<8x768xf32>
    tpu.vector_store %arg2[%c0_1, %c0_2], %0 {strides = array<i32>} : memref<8x768xf32, #tpu.memory_space<vmem>>, vector<8x768xf32>,
    return
  }
  func.func @transform_0(%arg0: i32) -> (i32, i32) {
    %c0_i32 = arith.constant 0 : i32
    %c0_i32_0 = arith.constant 0 : i32
    %c0_i32_1 = arith.constant 0 : i32
    return %c0_i32, %c0_i32_0 : i32, i32
  }
  func.func @transform_1(%arg0: i32) -> (i32, i32) {
    %c0_i32 = arith.constant 0 : i32
    %c0_i32_0 = arith.constant 0 : i32
    return %arg0, %c0_i32 : i32, i32
  }
}

</mosaic_0001>

<bundles_post_ra>
// kernel: tpu_custom_call.1
= control target key start
LH: loop header
LB: loop body
LE: loop exit
PB: predicated region body
PF: predicated region fallthrough
CT: control target
= control target key end

     0   :  { %6 = vsyncpa [#allocation3], 0  ;;  %s492_s0 = inlined_call_operand.hbm [shape: f32[8,768], index: 0, kind: input, shape index: {}]   ;;  %s493_s1 = inlined_call_operand.hbm [shape: f32[16,768], index: 1, kind: output, shape index: {}]  }
   0x1   :  { %7 = vsyncpa [#allocation4], 0 }
   0x2   :  { %9 = vsyncpa [#allocation4 + $0x1], 0  ;;  %s362_s6 = smov 0   ;;  %s364_s7 = smov 0  }
   0x3   :  { %s366_s8 = smov 0   ;;  %s368_s9 = smov 0  }
   0x4 LB: > { %s383_s10 = sadd.s32 4294967295, %s348_s9   ;;  %s194_s11 = sadd.s32 4294967294, %s348_s9   ;;  %s348_s9 = sphi %s368_s9, %s509_s9   ;;  %s344_s8 = sphi %s366_s8, %s508_s8   ;;  %s340_s7 = sphi %s364_s7, %s507_s7   ;;  %s336_s6 = sphi %s362_s6, %s506_s6  }
   0x5   : > { %s387_s12 = sadd.s32 1, %s348_s9   ;;  %s43_s13 = sadd.s32 1, %s344_s8 }
   0x6   : > { %s40_s14 = ssub.s32 %s348_s9, %s387_s12  ;;  %p53_p0 = scmp.ne.s32.totalorder %s344_s8, %s340_s7 }
   0x7   : > { %p41_p1 = scmp.eq.s32.totalorder %s40_s14, 0  ;;  %p54_p2 = scmp.eq.s32.totalorder %s383_s10, 1 }
   0x8   : > { %p59_p3 = scmp.ne.s32.totalorder %s340_s7, %s336_s6  ;;  %p60_p4 = scmp.eq.s32.totalorder %s194_s11, 1 }
   0x9   : > { %s398_s15 = scalar_select %p41_p1, %s344_s8, %s43_s13  }
   0xa   : > { %p400_p5 = por %p54_p2, %p53_p0  ;;  %p404_p6 = por %p60_p4, %p59_p3 }
   0xb   : > { %p195_p7 = scmp.ge.s32.totalorder %s348_s9, 1  ;;  %p67_p8 = scmp.lt.s32.totalorder %s348_s9, 3 }
   0xc   : > { %s497_s16 = scalar_select %p400_p5, 1, 0 }
   0xd   : > { %s498_s17 = scalar_select %p404_p6, 1, 0 }
   0xe   : > { %p494_p9 = scmp.eq.s32.totalorder %s383_s10, 0  ;;  %p411_p10 = pnand %p195_p7, %p67_p8 }
   0xf   : > { %s350_s19 = smov [#allocation2]   ;;  %s254_s24 = scalar_lea.hbm %s492_s0, 768 }
  0x10   : > { %s499_s18 = scalar_select %p411_p10, 1, 0 }
  0x11   : > { %s80_s20 = sshll.u32 %s350_s19, 4  ;;  %p210_p11 = pneg %p411_p10  ;;  %s81_s20 = int_to_ptr.vmem [resolvable:$true] %s80_s20 }
  0x12   : > { %p255_p13 = scmp.ne.s32.totalorder %s492_s0, %s254_s24  ;;  %p261_p3 = scmp.lt.u32.totalorder %s254_s24, %s492_s0 }
  0x13   : > { %p419_p12 = pnand %p494_p9, %p210_p11 }
  0x15   : > { %p256_p0 = pneg %p419_p12 }
  0x17   : > { %p257_p1 = pnand %p256_p0, %p255_p13 }
  0x19   : > { %p258_p2 = pneg %p257_p1 }
  0x1b   : > { %p263_p4 = pnand %p261_p3, %p258_p2 }
  0x1d   : > { %266 = shalt.err (!%p263_p4)
}
  0x1e   : > { %s267_s29 = scalar_lea.vmem %s81_s20, 768  ;;  %p275_p9 = scmp.lt.s32.totalorder %s81_s20, %s81_s20 }
  0x1f   : > { %p268_p7 = scmp.ne.s32.totalorder %s81_s20, %s267_s29  ;;  %p276_p6 = scmp.lt.s32.totalorder %s267_s29, %s267_s29 }
  0x21   : > { %p270_p8 = pnand %p268_p7, %p256_p0  ;;  %p277_p5 = por %p276_p6, %p275_p9 }
  0x23   : > { %p271_p11 = pneg %p270_p8 }
  0x25   : > { %p278_p10 = pnand %p277_p5, %p271_p11 }
  0x27   : > { %281 = shalt.err (!%p278_p10)
}
  0x28   : > { %213 = dma.hbm_to_vmem [thread:$0]  (!%p419_p12), %s492_s0, 768, %s81_s20, [#allocation3]  }
  0x29   : > { %p501_p13 = scmp.ne.s32.totalorder %s499_s18, 0 }
  0x2a   : > { %p502_p1 = scmp.eq.s32.totalorder (!%p501_p13), %s383_s10, 0 }
  0x2b   : > { %93 = sbr.rel (%p501_p13) target bundleno = 78 (0x4e), region = 24 }
  0x32   : > { %327 = dma.done.wait (%p502_p1), [#allocation3], 768   ;;  %p503_p0 = pmov %p502_p1 }
  0x33   : > { %s105_s3 = sand.u32 1, %s340_s7   ;;  %s203_s5 = smul.u32 768, %s383_s10  ;;  %v108_v0 = vld [vmem:[#allocation2] sm:$0xff]  ;;  %v109_v1 = vld [vmem:[#allocation2 + $0x8] sm:$0xff]  ;;  %v110_v2 = vld [vmem:[#allocation2 + $0x10] sm:$0xff] }
  0x34   : > { %329 = vsyncadd (%p503_p0), [#allocation3], 4294966528  ;;  %s202_s4 = smul.u32 48, %s105_s3  ;;  %v111_v3 = vld [vmem:[#allocation2 + $0x18] sm:$0xff]  ;;  %v112_v4 = vld [vmem:[#allocation2 + $0x20] sm:$0xff]  ;;  %s121_s10 = scalar_lea.sflag [#allocation4], %s105_s3 }
  0x35   : > { %s452_s19 = scalar_lea.hbm %s493_s1, %s203_s5  ;;  %v113_v5 = vld [vmem:[#allocation2 + $0x28] sm:$0xff]  ;;  %p504_p6 = scmp.ne.s32.totalorder %s497_s16, 0 }
  0x36   : > { %s107_s11 = scalar_lea.vmem [#allocation5], %s202_s4  ;;  %s351_s21 = smov [#allocation5]  }
  0x37   : > { %s135_s13 = sshll.u32 %s107_s11, 4  ;;  %114 = vst [vmem:[%s107_s11] sm:$0xff] %v108_v0  ;;  %115 = vst [vmem:[%s107_s11 + $0x8] sm:$0xff] %v109_v1  ;;  %s286_s22 = sshll.u32 %s351_s21, 4  ;;  %s447_s13 = int_to_ptr.vmem [resolvable:$true] %s135_s13  ;;  %s287_s22 = int_to_ptr.vmem [resolvable:$false] %s286_s22 }
  0x38   : > { %116 = vst [vmem:[%s107_s11 + $0x10] sm:$0xff] %v110_v2  ;;  %117 = vst [vmem:[%s107_s11 + $0x18] sm:$0xff] %v111_v3  ;;  %s282_s20 = scalar_lea.vmem %s447_s13, 768  ;;  %s288_s23 = scalar_lea.vmem %s287_s22, 1536 }
  0x39   : > { %118 = vst [vmem:[%s107_s11 + $0x20] sm:$0xff] %v112_v4  ;;  %119 = vst [vmem:[%s107_s11 + $0x28] sm:$0xff] %v113_v5  ;;  %p283_p5 = scmp.ne.s32.totalorder %s447_s13, %s282_s20  ;;  %p289_p12 = scmp.lt.s32.totalorder %s447_s13, %s287_s22 }
  0x3a   : > { %p290_p2 = scmp.lt.s32.totalorder %s288_s23, %s282_s20 }
  0x3b   : > { %p284_p9 = pnand %p283_p5, %p504_p6 }
  0x3c   : > { %p291_p3 = por %p290_p2, %p289_p12 }
  0x3d   : > { %p285_p10 = pneg %p284_p9 }
  0x3f   : > { %p292_p4 = pnand %p291_p3, %p285_p10 }
  0x41   : > { %295 = shalt.err (!%p292_p4)
}
  0x42   : > { %s296_s24 = scalar_lea.hbm %s452_s19, 768  ;;  %s300_s27 = scalar_lea.hbm %s493_s1, 1536 }
  0x43   : > { %p297_p7 = scmp.ne.s32.totalorder %s452_s19, %s296_s24  ;;  %p301_p13 = scmp.lt.u32.totalorder %s452_s19, %s493_s1 }
  0x44   : > { %p302_p1 = scmp.lt.u32.totalorder %s300_s27, %s296_s24  ;;  %p304_p5 = scmp.lt.u32.totalorder %s296_s24, %s452_s19 }
  0x45   : > { %p298_p8 = pnand %p297_p7, %p504_p6 }
  0x46   : > { %p303_p0 = por %p302_p1, %p301_p13 }
  0x47   : > { %p299_p11 = pneg %p298_p8 }
  0x48   : > { %p305_p9 = por %p304_p5, %p303_p0 }
  0x4a   : > { %p306_p10 = pnand %p305_p9, %p299_p11 }
  0x4c   : > { %309 = shalt.err (!%p306_p10)
}
  0x4d   : > { %208 = dma.vmem_to_hbm [thread:$0]  (%p504_p6), %s447_s13, 768, %s452_s19, %s121_s10  }
  0x4e PF: > { %p220_p12 = scmp.ge.s32.totalorder %s348_s9, 2  ;;  %s147_s30 = sand.u32 1, %s336_s6  }
  0x4f   : > { %p505_p2 = scmp.ne.s32.totalorder %s498_s17, 0  ;;  %s148_s2 = scalar_lea.sflag [#allocation4], %s147_s30 }
  0x51   : > { %p215_p3 = pnand %p220_p12, %p505_p2 }
  0x53   : > { %331 = dma.done.wait (!%p215_p3), %s148_s2, 768  }
  0x54   : > { %333 = vsyncadd (!%p215_p3), %s148_s2, 4294966528  ;;  %p12_p4 = scmp.ge.s32.totalorder %s387_s12, 4   ;;  %s506_s6 = smov %s340_s7 }
  0x55   : > { %s507_s7 = smov %s344_s8  ;;  %s508_s8 = smov %s398_s15 }
  0x56   : > { %s509_s9 = smov %s387_s12  ;;  %14 = sbr.rel (!%p12_p4) target bundleno = 4 (0x4), region = 61 }
  0x5d   :  { %153 = vsyncpa [#allocation3], 1 }
  0x5e   :  { %155 = vsyncpa [#allocation3 + $0x1], 1 }
  0x5f   :  { %156 = vsyncpa [#allocation4], 1 }
  0x60   :  { %158 = vsyncpa [#allocation4 + $0x1], 1 }

</bundles_post_ra>
